<compile_context>
chip_gen: v7x
topology: tpu7x:2x2x1
jax: 0.10.0
libtpu: 0.0.40
codegen_flags: <defaults>
</compile_context>

<pallas_src>
import functools

import jax
import jax.numpy as jnp
from jax.experimental import pallas as pl
from jax.experimental.pallas import tpu as pltpu

HIDDEN = 256  # fixed by the module definition


def _round_up(n, m):
    return ((n + m - 1) // m) * m


def _cdiv(a, b):
    return (a + b - 1) // b


def _generator_kernel(x_ref, w1_ref, b1_ref, w2_ref, b2_ref, o_ref):
    # ---- Linear(z_dim, 256): bf16 operands, f32 accumulation on the MXU ----
    h = jnp.dot(x_ref[...], w1_ref[...], preferred_element_type=jnp.float32)
    h = h + b1_ref[...]                       # (1, 256) broadcasts over rows
    # ---- LeakyReLU(0.01): single vmax instead of compare+select ----
    h = jnp.maximum(h, 0.01 * h)
    # ---- Linear(256, img_dim): hidden cast to bf16, keep f32 accumulate ----
    y = jnp.dot(h.astype(jnp.bfloat16), w2_ref[...],
                preferred_element_type=jnp.float32)
    y = y + b2_ref[...]                       # (1, img_dim)
    # ---- Tanh in f32 (portable across v5e/v6e/v7x) ----
    o_ref[...] = jnp.tanh(y).astype(o_ref.dtype)


def _const_param_spec(block_shape):
    """Grid-invariant parameter block; single-buffered when supported."""
    index_map = lambda i: (0, 0)
    if hasattr(pl, "Buffered"):
        try:
            return pl.BlockSpec(block_shape, index_map,
                                pipeline_mode=pl.Buffered(1))
        except TypeError:  # older jax without the pipeline_mode kwarg
            pass
    return pl.BlockSpec(block_shape, index_map)


@functools.partial(jax.jit, static_argnames=("batch_tile",))
def generator_forward(x, w1, b1, w2, b2, *, batch_tile=None):
    """x: (B, z_dim) -> (B, img_dim) float32. Weights may be bf16 or f32."""
    B, z_dim = x.shape
    img_dim = w2.shape[-1]
    z_pad = _round_up(z_dim, 128)             # lane-dense LHS, full MXU K pass

    # Batch tiling: multiple of 8 (sublanes); padding bounded instead of
    # rounding B up to the cap; >=2 grid steps when B >= 16 so both v7x
    # TensorCores are used (cheap extra step on v5e/v6e).
    if batch_tile is None:
        cap = 512
        n_steps = max(1, _cdiv(B, cap))
        if B >= 16:
            n_steps = max(n_steps, 2)
        batch_tile = _round_up(_cdiv(B, n_steps), 8)
    batch_tile = max(8, _round_up(batch_tile, 8))
    B_pad = _round_up(B, batch_tile)
    grid = (B_pad // batch_tile,)

    # Wrapper-side casts / padding (fused, cheap; halves matmul-operand DMA).
    x_p = x.astype(jnp.bfloat16)
    if (B_pad - B) or (z_pad - z_dim):
        x_p = jnp.pad(x_p, ((0, B_pad - B), (0, z_pad - z_dim)))
    w1_p = w1.astype(jnp.bfloat16)
    if z_pad != z_dim:
        w1_p = jnp.pad(w1_p, ((0, z_pad - z_dim), (0, 0)))
    b1_p = b1.astype(jnp.float32).reshape(1, HIDDEN)
    w2_p = w2.astype(jnp.bfloat16)
    b2_p = b2.astype(jnp.float32).reshape(1, img_dim)

    # VMEM budget: double-buffered x/out tiles + parameters (counted twice for
    # safety if single-buffering is unavailable), capped at 40 MiB for v7x.
    param_bytes = (z_pad * HIDDEN * 2 + HIDDEN * 4
                   + HIDDEN * img_dim * 2 + img_dim * 4)
    vmem_est = (2 * batch_tile * z_pad * 2        # x tiles (bf16)
                + 2 * batch_tile * img_dim * 4    # out tiles (f32)
                + 2 * param_bytes)
    vmem_limit = int(min(max(vmem_est + (4 << 20), 16 << 20), 40 << 20))

    out = pl.pallas_call(
        _generator_kernel,
        out_shape=jax.ShapeDtypeStruct((B_pad, img_dim), jnp.float32),
        grid=grid,
        in_specs=[
            # x: tiled over the batch axis only
            pl.BlockSpec((batch_tile, z_pad), lambda i: (i, 0)),
            # parameters: full arrays, same block every grid step
            _const_param_spec((z_pad, HIDDEN)),
            _const_param_spec((1, HIDDEN)),
            _const_param_spec((HIDDEN, img_dim)),
            _const_param_spec((1, img_dim)),
        ],
        # Last block dim == full img_dim (no padding, no post-kernel copy).
        out_specs=pl.BlockSpec((batch_tile, img_dim), lambda i: (i, 0)),
        compiler_params=pltpu.CompilerParams(
            dimension_semantics=("parallel",),
            vmem_limit_bytes=vmem_limit,
        ),
    )(x_p, w1_p, b1_p, w2_p, b2_p)

    # Only the (bounded, usually zero) batch padding needs slicing away.
    return out if B_pad == B else out[:B]


def init_generator_params(key, z_dim, img_dim):
    """PyTorch-style init U(-1/sqrt(fan_in), 1/sqrt(fan_in)); weights bf16 at rest."""
    k1, k2, k3, k4 = jax.random.split(key, 4)
    bound1 = 1.0 / (z_dim ** 0.5)
    bound2 = 1.0 / (HIDDEN ** 0.5)
    # Stored as (in, out) = transpose of torch's (out, in) weight layout.
    w1 = jax.random.uniform(k1, (z_dim, HIDDEN), jnp.float32, -bound1, bound1)
    b1 = jax.random.uniform(k2, (1, HIDDEN), jnp.float32, -bound1, bound1)
    w2 = jax.random.uniform(k3, (HIDDEN, img_dim), jnp.float32, -bound2, bound2)
    b2 = jax.random.uniform(k4, (1, img_dim), jnp.float32, -bound2, bound2)
    return w1.astype(jnp.bfloat16), b1, w2.astype(jnp.bfloat16), b2


def _reference_forward(x, w1, b1, w2, b2):
    """Mirror the kernel's bf16-operand / f32-accumulate arithmetic."""
    h = jnp.dot(x.astype(jnp.bfloat16), w1.astype(jnp.bfloat16),
                preferred_element_type=jnp.float32) + b1.astype(jnp.float32)
    h = jnp.maximum(h, 0.01 * h)
    y = jnp.dot(h.astype(jnp.bfloat16), w2.astype(jnp.bfloat16),
                preferred_element_type=jnp.float32) + b2.astype(jnp.float32)
    return jnp.tanh(y)


if __name__ == "__main__":
    key = jax.random.PRNGKey(0)
    k_param, k_x = jax.random.split(key)

    # Small shapes consistent with the module (img_dim=784 exercises the
    # non-multiple-of-128 output path; B=8 keeps it tiny).
    B, z_dim, img_dim = 8, 64, 784
    w1, b1, w2, b2 = init_generator_params(k_param, z_dim, img_dim)
    x = jax.random.normal(k_x, (B, z_dim), jnp.float32)

    out = generator_forward(x, w1, b1, w2, b2)
    out = jax.block_until_ready(out)

    ref = _reference_forward(x, w1, b1, w2, b2)
    assert out.shape == (B, img_dim), out.shape
    assert jnp.allclose(out, ref, atol=2e-3, rtol=2e-3), "mismatch vs reference"

    print("KERNEL_OK")
</pallas_src>

<mosaic_0001>
module attributes {stable_mosaic.version = 11 : i64} {
  func.func @_generator_kernel(%arg0: i32, %arg1: memref<8x128xbf16, #tpu.memory_space<vmem>>, %arg2: memref<128x256xbf16, #tpu.memory_space<vmem>>, %arg3: memref<1x256xf32, #tpu.memory_space<vmem>>, %arg4: memref<256x784xbf16, #tpu.memory_space<vmem>>, %arg5: memref<1x784xf32, #tpu.memory_space<vmem>>, %arg6: memref<8x784xf32, #tpu.memory_space<vmem>>) attributes {dimension_semantics = [#tpu.dimension_semantics<parallel>], iteration_bounds = array<i64: 1>, scalar_prefetch = 0 : i64, scratch_operands = 0 : i64, tpu.core_type = #tpu.core_type<tc>, window_params = [{transform_indices = @transform_0, window_bounds = array<i64: 8, 128>}, {pipeline_mode = #tpu.pipeline_mode<synchronous>, transform_indices = @transform_1, window_bounds = array<i64: 128, 256>}, {pipeline_mode = #tpu.pipeline_mode<synchronous>, transform_indices = @transform_2, window_bounds = array<i64: 1, 256>}, {pipeline_mode = #tpu.pipeline_mode<synchronous>, transform_indices = @transform_3, window_bounds = array<i64: 256, 784>}, {pipeline_mode = #tpu.pipeline_mode<synchronous>, transform_indices = @transform_4, window_bounds = array<i64: 1, 784>}, {transform_indices = @transform_5, window_bounds = array<i64: 8, 784>}]} {
    %c0 = arith.constant 0 : index
    %c0_0 = arith.constant 0 : index
    %0 = vector.load %arg1[%c0, %c0_0] : memref<8x128xbf16, #tpu.memory_space<vmem>>, vector<8x128xbf16>
    %c0_1 = arith.constant 0 : index
    %c0_2 = arith.constant 0 : index
    %1 = vector.load %arg2[%c0_1, %c0_2] : memref<128x256xbf16, #tpu.memory_space<vmem>>, vector<128x256xbf16>
    %cst = arith.constant dense<0.000000e+00> : vector<8x256xf32>
    %2 = tpu.matmul %0, %1, %cst {dimension_numbers = #tpu.dot_dimension_numbers<[1], [0], [0], [1], [0, 0, 1, 1], [], []>} : vector<8x128xbf16>, vector<128x256xbf16>, vector<8x256xf32> -> vector<8x256xf32>
    %c0_3 = arith.constant 0 : index
    %c0_4 = arith.constant 0 : index
    %3 = vector.load %arg3[%c0_3, %c0_4] : memref<1x256xf32, #tpu.memory_space<vmem>>, vector<1x256xf32>
    %4 = vector.broadcast %3 : vector<1x256xf32> to vector<8x256xf32>
    %5 = arith.addf %2, %4 : vector<8x256xf32>
    %cst_5 = arith.constant 0.00999999977 : f32
    %6 = vector.broadcast %cst_5 : f32 to vector<8x256xf32>
    %7 = arith.mulf %6, %5 : vector<8x256xf32>
    %8 = arith.maximumf %5, %7 : vector<8x256xf32>
    %9 = arith.truncf %8 : vector<8x256xf32> to vector<8x256xbf16>
    %c0_6 = arith.constant 0 : index
    %c0_7 = arith.constant 0 : index
    %10 = vector.load %arg4[%c0_6, %c0_7] : memref<256x784xbf16, #tpu.memory_space<vmem>>, vector<256x784xbf16>
    %cst_8 = arith.constant dense<0.000000e+00> : vector<8x784xf32>
    %11 = tpu.matmul %9, %10, %cst_8 {dimension_numbers = #tpu.dot_dimension_numbers<[1], [0], [0], [1], [0, 0, 1, 1], [], []>} : vector<8x256xbf16>, vector<256x784xbf16>, vector<8x784xf32> -> vector<8x784xf32>
    %c0_9 = arith.constant 0 : index
    %c0_10 = arith.constant 0 : index
    %12 = vector.load %arg5[%c0_9, %c0_10] : memref<1x784xf32, #tpu.memory_space<vmem>>, vector<1x784xf32>
    %13 = vector.broadcast %12 : vector<1x784xf32> to vector<8x784xf32>
    %14 = arith.addf %11, %13 : vector<8x784xf32>
    %15 = math.tanh %14 : vector<8x784xf32>
    %c0_11 = arith.constant 0 : index
    %c0_12 = arith.constant 0 : index
    %16 = vector.load %arg6[%c0_11, %c0_12] : memref<8x784xf32, #tpu.memory_space<vmem>>, vector<8x784xf32>
    tpu.vector_store %arg6[%c0_11, %c0_12], %15 {strides = array<i32>} : memref<8x784xf32, #tpu.memory_space<vmem>>, vector<8x784xf32>,
    return
  }
  func.func @transform_0(%arg0: i32) -> (i32, i32) {
    %c0_i32 = arith.constant 0 : i32
    %c0_i32_0 = arith.constant 0 : i32
    return %arg0, %c0_i32 : i32, i32
  }
  func.func @transform_1(%arg0: i32) -> (i32, i32) {
    %c0_i32 = arith.constant 0 : i32
    %c0_i32_0 = arith.constant 0 : i32
    %c0_i32_1 = arith.constant 0 : i32
    return %c0_i32, %c0_i32_0 : i32, i32
  }
  func.func @transform_2(%arg0: i32) -> (i32, i32) {
    %c0_i32 = arith.constant 0 : i32
    %c0_i32_0 = arith.constant 0 : i32
    %c0_i32_1 = arith.constant 0 : i32
    return %c0_i32, %c0_i32_0 : i32, i32
  }
  func.func @transform_3(%arg0: i32) -> (i32, i32) {
    %c0_i32 = arith.constant 0 : i32
    %c0_i32_0 = arith.constant 0 : i32
    %c0_i32_1 = arith.constant 0 : i32
    return %c0_i32, %c0_i32_0 : i32, i32
  }
  func.func @transform_4(%arg0: i32) -> (i32, i32) {
    %c0_i32 = arith.constant 0 : i32
    %c0_i32_0 = arith.constant 0 : i32
    %c0_i32_1 = arith.constant 0 : i32
    return %c0_i32, %c0_i32_0 : i32, i32
  }
  func.func @transform_5(%arg0: i32) -> (i32, i32) {
    %c0_i32 = arith.constant 0 : i32
    %c0_i32_0 = arith.constant 0 : i32
    return %arg0, %c0_i32 : i32, i32
  }
}

</mosaic_0001>

<bundles_post_ra>
// kernel: generator_forward.1
= control target key start
LH: loop header
LB: loop body
LE: loop exit
PB: predicated region body
PF: predicated region fallthrough
CT: control target
= control target key end

     0   :  { %v1485_v2 = vmov 0   ;;  %s1945_s0 = inlined_call_operand.vmem [shape: bf16[8,128], index: 0, kind: input, shape index: {}]   ;;  %s1946_s1 = inlined_call_operand.vmem [shape: bf16[128,256], index: 1, kind: input, shape index: {}]   ;;  %s1947_s2 = inlined_call_operand.vmem [shape: f32[1,256], index: 2, kind: input, shape index: {}]   ;;  %s1948_s3 = inlined_call_operand.vmem [shape: bf16[256,784], index: 3, kind: input, shape index: {}]   ;;  %s1949_s4 = inlined_call_operand.vmem [shape: f32[1,784], index: 4, kind: input, shape index: {}]   ;;  %s1950_s5 = inlined_call_operand.hbm [shape: f32[8,784], index: 5, kind: output, shape index: {}]  }
   0x1   :  { %v1263_v0 = vld [vmem:[%s1946_s1 + $0x4] ss:$8 sps:$4 sm:$0xff]   ;;  %v1265_v1 = vld [vmem:[%s1946_s1] ss:$8 sps:$4 sm:$0xff]   ;;  %163 = vmatprep.mubr.bf16.mxu0 %v1485_v2  ;;  %v1266_v3 = vld [vmem:[%s1946_s1 + $0x14] ss:$8 sps:$4 sm:$0xff]  }
   0x2   :  { %131 = vmatprep.subr.bf16.mxu0 %v1263_v0  ;;  %v1268_v4 = vld [vmem:[%s1946_s1 + $0x10] ss:$8 sps:$4 sm:$0xff]   ;;  %v1269_v5 = vld [vmem:[%s1946_s1 + $0x24] ss:$8 sps:$4 sm:$0xff]   ;;  %v1271_v6 = vld [vmem:[%s1946_s1 + $0x20] ss:$8 sps:$4 sm:$0xff]  }
   0x3   :  { %132 = vmatpush1.bf16.msra.mxu0 %v1265_v1  ;;  %v1272_v7 = vld [vmem:[%s1946_s1 + $0x34] ss:$8 sps:$4 sm:$0xff]   ;;  %v1274_v8 = vld [vmem:[%s1946_s1 + $0x30] ss:$8 sps:$4 sm:$0xff]   ;;  %v1287_v9 = vld [vmem:[%s1948_s3 + $0x4] ss:$28 sps:$4 sm:$0xff]  }
   0x4   :  { %133 = vmatprep.subr.bf16.mxu0 %v1266_v3  ;;  %v1275_v10 = vld [vmem:[%s1946_s1 + $0x44] ss:$8 sps:$4 sm:$0xff]   ;;  %919 = vmatprep.subr.bf16.mxu1 %v1287_v9  ;;  %v1292_v11 = vld [vmem:[%s1948_s3] ss:$28 sps:$4 sm:$0xff]   ;;  %v1298_v15 = vld [vmem:[%s1948_s3 + $0x38] ss:$28 sps:$4 sm:$0xff]  }
   0x5   :  { %v1293_v12 = vld [vmem:[%s1948_s3 + $0x3c] ss:$28 sps:$4 sm:$0xff]   ;;  %v1277_v13 = vld [vmem:[%s1946_s1 + $0x40] ss:$8 sps:$4 sm:$0xff]   ;;  %920 = vmatpush1.bf16.msra.mxu1 %v1292_v11  ;;  %v1299_v16 = vld [vmem:[%s1948_s3 + $0x74] ss:$28 sps:$4 sm:$0xff]  }
   0x6   :  { %v1278_v14 = vld [vmem:[%s1946_s1 + $0x54] ss:$8 sps:$4 sm:$0xff]   ;;  %921 = vmatprep.subr.bf16.mxu1 %v1293_v12  ;;  %v1280_v17 = vld [vmem:[%s1946_s1 + $0x50] ss:$8 sps:$4 sm:$0xff]   ;;  %v1281_v18 = vld [vmem:[%s1946_s1 + $0x64] ss:$8 sps:$4 sm:$0xff]  }
   0x7   :  { %134 = vmatpush1.bf16.msra.mxu0 %v1268_v4  ;;  %v1304_v19 = vld [vmem:[%s1948_s3 + $0x70] ss:$28 sps:$4 sm:$0xff]   ;;  %v1283_v21 = vld [vmem:[%s1946_s1 + $0x60] ss:$8 sps:$4 sm:$0xff]   ;;  %v1284_v22 = vld [vmem:[%s1946_s1 + $0x74] ss:$8 sps:$4 sm:$0xff]  }
   0x8   :  { %135 = vmatprep.subr.bf16.mxu0 %v1269_v5  ;;  %v1305_v20 = vld [vmem:[%s1948_s3 + $0xac] ss:$28 sps:$4 sm:$0xff]   ;;  %v1311_v24 = vld [vmem:[%s1948_s3 + $0xe4] ss:$28 sps:$4 sm:$0xff]   ;;  %v1286_v25 = vld [vmem:[%s1946_s1 + $0x70] ss:$8 sps:$4 sm:$0xff]  }
   0x9   :  { %922 = vmatpush1.bf16.msra.mxu1 %v1298_v15  ;;  %v1310_v23 = vld [vmem:[%s1948_s3 + $0xa8] ss:$28 sps:$4 sm:$0xff]   ;;  %v1316_v27 = vld [vmem:[%s1948_s3 + $0xe0] ss:$28 sps:$4 sm:$0xff]   ;;  %v1322_v32 = vld [vmem:[%s1948_s3 + $0x118] ss:$28 sps:$4 sm:$0xff]  }
   0xa   :  { %923 = vmatprep.subr.bf16.mxu1 %v1299_v16  ;;  %v1291_v26 = vld [vmem:[%s1948_s3 + $0xc] ss:$28 sps:$4 sm:$0xff]   ;;  %v1317_v28 = vld [vmem:[%s1948_s3 + $0x11c] ss:$28 sps:$4 sm:$0xff]   ;;  %v22_v29 = vld [vmem:[%s1945_s0] sm:$0xf] }
   0xb   :  { %136 = vmatpush1.bf16.msra.mxu0 %v1271_v6  ;;  %v1289_v30 = vld [vmem:[%s1948_s3 + $0x8] ss:$28 sps:$4 sm:$0xff]   ;;  %v1323_v33 = vld [vmem:[%s1948_s3 + $0x154] ss:$28 sps:$4 sm:$0xff]   ;;  %v1295_v34 = vld [vmem:[%s1948_s3 + $0x40] ss:$28 sps:$4 sm:$0xff]  }
   0xc   :  { %137 = vmatprep.subr.bf16.mxu0 %v1272_v7  ;;  %v1297_v31 = vld [vmem:[%s1948_s3 + $0x44] ss:$28 sps:$4 sm:$0xff]   ;;  %v1303_v35 = vld [vmem:[%s1948_s3 + $0x7c] ss:$28 sps:$4 sm:$0xff]   ;;  %v1328_v36 = vld [vmem:[%s1948_s3 + $0x150] ss:$28 sps:$4 sm:$0xff]  }
   0xd   :  { %924 = vmatpush1.bf16.msra.mxu1 %v1304_v19  ;;  %v1329_v37 = vld [vmem:[%s1948_s3 + $0x18c] ss:$28 sps:$4 sm:$0xff]   ;;  %v1301_v38 = vld [vmem:[%s1948_s3 + $0x78] ss:$28 sps:$4 sm:$0xff]   ;;  %v1335_v41 = vld [vmem:[%s1948_s3 + $0x1c4] ss:$28 sps:$4 sm:$0xff]  }
   0xe   :  { %925 = vmatprep.subr.bf16.mxu1 %v1305_v20  ;;  %v1309_v39 = vld [vmem:[%s1948_s3 + $0xb4] ss:$28 sps:$4 sm:$0xff]   ;;  %v1334_v40 = vld [vmem:[%s1948_s3 + $0x188] ss:$28 sps:$4 sm:$0xff]   ;;  %v1340_v44 = vld [vmem:[%s1948_s3 + $0x1c0] ss:$28 sps:$4 sm:$0xff]  }
   0xf   :  { %138 = vmatpush1.bf16.msra.mxu0 %v1274_v8  ;;  %v1307_v42 = vld [vmem:[%s1948_s3 + $0xb0] ss:$28 sps:$4 sm:$0xff]   ;;  %v1341_v45 = vld [vmem:[%s1948_s3 + $0x1fc] ss:$28 sps:$4 sm:$0xff]   ;;  %v1313_v46 = vld [vmem:[%s1948_s3 + $0xe8] ss:$28 sps:$4 sm:$0xff]  }
  0x10   :  { %139 = vmatprep.subr.bf16.mxu0 %v1275_v10  ;;  %v1315_v43 = vld [vmem:[%s1948_s3 + $0xec] ss:$28 sps:$4 sm:$0xff]   ;;  %v1346_v47 = vld [vmem:[%s1948_s3 + $0x1f8] ss:$28 sps:$4 sm:$0xff]   ;;  %v1321_v48 = vld [vmem:[%s1948_s3 + $0x124] ss:$28 sps:$4 sm:$0xff]  }
  0x11   :  { %926 = vmatpush1.bf16.msra.mxu1 %v1310_v23  ;;  %v1347_v49 = vld [vmem:[%s1948_s3 + $0x234] ss:$28 sps:$4 sm:$0xff]   ;;  %v1319_v50 = vld [vmem:[%s1948_s3 + $0x120] ss:$28 sps:$4 sm:$0xff]   ;;  %v1353_v53 = vld [vmem:[%s1948_s3 + $0x26c] ss:$28 sps:$4 sm:$0xff]  }
  0x12   :  { %927 = vmatprep.subr.bf16.mxu1 %v1311_v24  ;;  %v1352_v51 = vld [vmem:[%s1948_s3 + $0x230] ss:$28 sps:$4 sm:$0xff]   ;;  %v1327_v52 = vld [vmem:[%s1948_s3 + $0x15c] ss:$28 sps:$4 sm:$0xff]   ;;  %v1358_v55 = vld [vmem:[%s1948_s3 + $0x268] ss:$28 sps:$4 sm:$0xff]  }
  0x13   :  { %140 = vmatpush1.bf16.msra.mxu0 %v1277_v13  ;;  %v1325_v54 = vld [vmem:[%s1948_s3 + $0x158] ss:$28 sps:$4 sm:$0xff]   ;;  %v1359_v57 = vld [vmem:[%s1948_s3 + $0x2a4] ss:$28 sps:$4 sm:$0xff]   ;;  %v1331_v58 = vld [vmem:[%s1948_s3 + $0x190] ss:$28 sps:$4 sm:$0xff]  }
  0x14   :  { %141 = vmatprep.subr.bf16.mxu0 %v1278_v14  ;;  %v1333_v56 = vld [vmem:[%s1948_s3 + $0x194] ss:$28 sps:$4 sm:$0xff]   ;;  %v1364_v59 = vld [vmem:[%s1948_s3 + $0x2a0] ss:$28 sps:$4 sm:$0xff]   ;;  %v1339_v60 = vld [vmem:[%s1948_s3 + $0x1cc] ss:$28 sps:$4 sm:$0xff]  }
  0x15   :  { %928 = vmatpush1.bf16.msra.mxu1 %v1316_v27  ;;  %v1365_v61 = vld [vmem:[%s1948_s3 + $0x2dc] ss:$28 sps:$4 sm:$0xff]   ;;  %v1337_v62 = vld [vmem:[%s1948_s3 + $0x1c8] ss:$28 sps:$4 sm:$0xff]   ;;  %v1357_v4 = vld [vmem:[%s1948_s3 + $0x274] ss:$28 sps:$4 sm:$0xff]  }
  0x16   :  { %929 = vmatprep.subr.bf16.mxu1 %v1317_v28  ;;  %v1370_v63 = vld [vmem:[%s1948_s3 + $0x2d8] ss:$28 sps:$4 sm:$0xff]   ;;  %v1345_v0 = vld [vmem:[%s1948_s3 + $0x204] ss:$28 sps:$4 sm:$0xff]  }
  0x17   :  { %142 = vmatpush1.bf16.msra.mxu0 %v1280_v17  ;;  %v1343_v1 = vld [vmem:[%s1948_s3 + $0x200] ss:$28 sps:$4 sm:$0xff]   ;;  %v1349_v3 = vld [vmem:[%s1948_s3 + $0x238] ss:$28 sps:$4 sm:$0xff]  }
  0x18   :  { %143 = vmatprep.subr.bf16.mxu0 %v1281_v18  ;;  %v1351_v2 = vld [vmem:[%s1948_s3 + $0x23c] ss:$28 sps:$4 sm:$0xff]  }
  0x19   :  { %930 = vmatpush1.bf16.msra.mxu1 %v1322_v32 }
  0x1a   :  { %931 = vmatprep.subr.bf16.mxu1 %v1323_v33 }
  0x1b   :  { %144 = vmatpush1.bf16.msra.mxu0 %v1283_v21 }
  0x1c   :  { %145 = vmatprep.subr.bf16.mxu0 %v1284_v22 }
  0x1d   :  { %932 = vmatpush1.bf16.msra.mxu1 %v1328_v36 }
  0x1e   :  { %933 = vmatprep.subr.bf16.mxu1 %v1329_v37 }
  0x1f   :  { %146 = vmatpush1.bf16.msra.mxu0 %v1286_v25 }
  0x20   :  { %960 = vmatprep.subr.bf16.mxu0 %v1291_v26 }
  0x21   :  { %934 = vmatpush1.bf16.msra.mxu1 %v1334_v40 }
  0x22   :  { %164 = vmatmul.mubr.bf16.vlgmr.msra.gmra.mrb[0].mxu0 %v22_v29  ;;  %935 = vmatprep.subr.bf16.mxu1 %v1335_v41 }
  0x23   :  { %961 = vmatpush1.bf16.msra.mxu0 %v1289_v30 }
  0x24   :  { %962 = vmatprep.subr.bf16.mxu0 %v1297_v31 }
  0x25   :  { %936 = vmatpush1.bf16.msra.mxu1 %v1340_v44 }
  0x26   :  { %937 = vmatprep.subr.bf16.mxu1 %v1341_v45 }
  0x27   :  { %963 = vmatpush1.bf16.msra.mxu0 %v1295_v34 }
  0x28   :  { %964 = vmatprep.subr.bf16.mxu0 %v1303_v35 }
  0x29   :  { %938 = vmatpush1.bf16.msra.mxu1 %v1346_v47 }
  0x2a   :  { %939 = vmatprep.subr.bf16.mxu1 %v1347_v49 }
  0x2b   :  { %965 = vmatpush1.bf16.msra.mxu0 %v1301_v38 }
  0x2c   :  { %966 = vmatprep.subr.bf16.mxu0 %v1309_v39 }
  0x2d   :  { %940 = vmatpush1.bf16.msra.mxu1 %v1352_v51 }
  0x2e   :  { %941 = vmatprep.subr.bf16.mxu1 %v1353_v53 }
  0x2f   :  { %967 = vmatpush1.bf16.msra.mxu0 %v1307_v42 }
  0x30   :  { %968 = vmatprep.subr.bf16.mxu0 %v1315_v43 }
  0x31   :  { %942 = vmatpush1.bf16.msra.mxu1 %v1358_v55 }
  0x32   :  { %943 = vmatprep.subr.bf16.mxu1 %v1359_v57 }
  0x33   :  { %969 = vmatpush1.bf16.msra.mxu0 %v1313_v46 }
  0x34   :  { %970 = vmatprep.subr.bf16.mxu0 %v1321_v48 }
  0x35   :  { %944 = vmatpush1.bf16.msra.mxu1 %v1364_v59 }
  0x36   :  { %945 = vmatprep.subr.bf16.mxu1 %v1365_v61 }
  0x37   :  { %971 = vmatpush1.bf16.msra.mxu0 %v1319_v50 }
  0x38   :  { %972 = vmatprep.subr.bf16.mxu0 %v1327_v52 }
  0x39   :  { %946 = vmatpush1.bf16.msra.mxu1 %v1370_v63 }
  0x3b   :  { %973 = vmatpush1.bf16.msra.mxu0 %v1325_v54 }
  0x3c   :  { %974 = vmatprep.subr.bf16.mxu0 %v1333_v56 }
  0x3f   :  { %975 = vmatpush1.bf16.msra.mxu0 %v1331_v58 }
  0x40   :  { %976 = vmatprep.subr.bf16.mxu0 %v1339_v60 }
  0x43   :  { %977 = vmatpush1.bf16.msra.mxu0 %v1337_v62 }
  0x44   :  { %978 = vmatprep.subr.bf16.mxu0 %v1345_v0 }
  0x47   :  { %979 = vmatpush1.bf16.msra.mxu0 %v1343_v1 }
  0x48   :  { %980 = vmatprep.subr.bf16.mxu0 %v1351_v2 }
  0x49   :  { %10 = vsyncpa [#allocation3], 0  ;;  %v1355_v5 = vld [vmem:[%s1948_s3 + $0x270] ss:$28 sps:$4 sm:$0xff]   ;;  %v1361_v7 = vld [vmem:[%s1948_s3 + $0x2a8] ss:$28 sps:$4 sm:$0xff]   ;;  %v41_v20 = vlaneseq }
  0x4a   :  { %v1363_v6 = vld [vmem:[%s1948_s3 + $0x2ac] ss:$28 sps:$4 sm:$0xff]   ;;  %v1369_v8 = vld [vmem:[%s1948_s3 + $0x2e4] ss:$28 sps:$4 sm:$0xff]   ;;  %v1371_v10 = vld [vmem:[%s1948_s3 + $0x314] ss:$28 sps:$4 sm:$0xff]  }
  0x4b   :  { %981 = vmatpush1.bf16.msra.mxu0 %v1349_v3  ;;  %v1367_v9 = vld [vmem:[%s1948_s3 + $0x2e0] ss:$28 sps:$4 sm:$0xff]   ;;  %v1373_v12 = vld [vmem:[%s1948_s3 + $0x318] ss:$28 sps:$4 sm:$0xff]   ;;  %v1376_v13 = vld [vmem:[%s1948_s3 + $0x310] ss:$28 sps:$4 sm:$0xff]   ;;  %947 = vmatprep.subr.bf16.mxu1 %v1371_v10 }
  0x4c   :  { %982 = vmatprep.subr.bf16.mxu0 %v1357_v4  ;;  %v1375_v11 = vld [vmem:[%s1948_s3 + $0x31c] ss:$28 sps:$4 sm:$0xff]   ;;  %948 = vmatpush1.bf16.msra.mxu1 %v1376_v13  ;;  %v1377_v14 = vld [vmem:[%s1948_s3 + $0x34c] ss:$28 sps:$4 sm:$0xff]   ;;  %v1381_v15 = vld [vmem:[%s1948_s3 + $0x354] ss:$28 sps:$4 sm:$0xff]  }
  0x4d   :  { %v1379_v16 = vld [vmem:[%s1948_s3 + $0x350] ss:$28 sps:$4 sm:$0xff]   ;;  %v1382_v17 = vld [vmem:[%s1948_s3 + $0x348] ss:$28 sps:$4 sm:$0xff]   ;;  %949 = vmatprep.subr.bf16.mxu1 %v1377_v14  ;;  %v1386_v19 = vld [vmem:[%s1948_s3 + $0x1d8] ss:$28 sps:$4 sm:$0xff]  }
  0x4e   :  { %v1385_v18 = vld [vmem:[%s1948_s3 + $0x14] ss:$28 sps:$4 sm:$0xff]   ;;  %v1766_v21 = vshrl.u32 %v41_v20, 7  ;;  %v39_v23 = vld [vmem:[%s1947_s2] sm:$0x3]  ;;  %vm1095_vm0 = vcmask 130048  }
  0x4f   :  { %983 = vmatpush1.bf16.msra.mxu0 %v1355_v5  ;;  %v1383_v38 = vld [vmem:[%s1948_s3 + $0x10] ss:$28 sps:$4 sm:$0xff]   ;;  %v1387_v39 = vld [vmem:[%s1948_s3 + $0x18] ss:$28 sps:$4 sm:$0xff]   ;;  %v1388_v43 = vld [vmem:[%s1948_s3 + $0x48] ss:$28 sps:$4 sm:$0xff]  }
  0x50   :  { %984 = vmatprep.subr.bf16.mxu0 %v1363_v6  ;;  %950 = vmatpush1.bf16.msra.mxu1 %v1382_v17  ;;  %v43_v22 = vsub.s32 0, %v1766_v21  ;;  %v47_v24 = vsub.s32 1, %v1766_v21  ;;  %v1390_v41 = vld [vmem:[%s1948_s3 + $0x4c] ss:$28 sps:$4 sm:$0xff]   ;;  %v1395_v45 = vld [vmem:[%s1948_s3 + $0x84] ss:$28 sps:$4 sm:$0xff]  }
  0x51   :  { %1001 = vmatprep.subr.bf16.mxu1 %v1385_v18  ;;  %v1391_v42 = vld [vmem:[%s1948_s3 + $0x210] ss:$28 sps:$4 sm:$0xff]   ;;  %v1396_v46 = vld [vmem:[%s1948_s3 + $0x248] ss:$28 sps:$4 sm:$0xff]   ;;  %v1393_v47 = vld [vmem:[%s1948_s3 + $0x80] ss:$28 sps:$4 sm:$0xff]  }
  0x52   :  { %v44_v25 = vrot.slane %v39_v23, %v43_v22  ;;  %v48_v26 = vrot.slane %v39_v23, %v47_v24  ;;  %v1392_v44 = vld [vmem:[%s1948_s3 + $0x50] ss:$28 sps:$4 sm:$0xff]   ;;  %v1397_v48 = vld [vmem:[%s1948_s3 + $0x88] ss:$28 sps:$4 sm:$0xff]   ;;  %v1400_v49 = vld [vmem:[%s1948_s3 + $0xbc] ss:$28 sps:$4 sm:$0xff]  }
  0x53   :  { %985 = vmatpush1.bf16.msra.mxu0 %v1361_v7  ;;  %v1401_v50 = vld [vmem:[%s1948_s3 + $0x280] ss:$28 sps:$4 sm:$0xff]   ;;  %v1398_v51 = vld [vmem:[%s1948_s3 + $0xb8] ss:$28 sps:$4 sm:$0xff]   ;;  %v1403_v55 = vld [vmem:[%s1948_s3 + $0xf0] ss:$28 sps:$4 sm:$0xff]  }
  0x54   :  { %986 = vmatprep.subr.bf16.mxu0 %v1369_v8  ;;  %v1402_v52 = vld [vmem:[%s1948_s3 + $0xc0] ss:$28 sps:$4 sm:$0xff]   ;;  %v1405_v53 = vld [vmem:[%s1948_s3 + $0xf4] ss:$28 sps:$4 sm:$0xff]   ;;  %v1410_v57 = vld [vmem:[%s1948_s3 + $0x12c] ss:$28 sps:$4 sm:$0xff]  }
  0x55   :  { %v1406_v54 = vld [vmem:[%s1948_s3 + $0x2b8] ss:$28 sps:$4 sm:$0xff]   ;;  %v1411_v58 = vld [vmem:[%s1948_s3 + $0x2f0] ss:$28 sps:$4 sm:$0xff]   ;;  %v1408_v59 = vld [vmem:[%s1948_s3 + $0x128] ss:$28 sps:$4 sm:$0xff]  }
  0x56   :  { %v1407_v56 = vld [vmem:[%s1948_s3 + $0xf8] ss:$28 sps:$4 sm:$0xff]   ;;  %v1412_v60 = vld [vmem:[%s1948_s3 + $0x130] ss:$28 sps:$4 sm:$0xff]   ;;  %v1415_v61 = vld [vmem:[%s1948_s3 + $0x164] ss:$28 sps:$4 sm:$0xff]  }
  0x57   :  { %987 = vmatpush1.bf16.msra.mxu0 %v1367_v9  ;;  %v1416_v62 = vld [vmem:[%s1948_s3 + $0x328] ss:$28 sps:$4 sm:$0xff]   ;;  %v1413_v63 = vld [vmem:[%s1948_s3 + $0x160] ss:$28 sps:$4 sm:$0xff]   ;;  %v1418_v3 = vld [vmem:[%s1948_s3 + $0x198] ss:$28 sps:$4 sm:$0xff]  }
  0x58   :  { %988 = vmatprep.subr.bf16.mxu0 %v1375_v11  ;;  %v1417_v0 = vld [vmem:[%s1948_s3 + $0x168] ss:$28 sps:$4 sm:$0xff]   ;;  %v1420_v1 = vld [vmem:[%s1948_s3 + $0x19c] ss:$28 sps:$4 sm:$0xff]   ;;  %v1425_v5 = vld [vmem:[%s1948_s3 + $0x1d4] ss:$28 sps:$4 sm:$0xff]  }
  0x59   :  { %v1421_v2 = vld [vmem:[%s1948_s3 + $0x360] ss:$28 sps:$4 sm:$0xff]   ;;  %v1423_v6 = vld [vmem:[%s1948_s3 + $0x1d0] ss:$28 sps:$4 sm:$0xff]   ;;  %v1426_v8 = vld [vmem:[%s1948_s3 + $0x208] ss:$28 sps:$4 sm:$0xff]  }
  0x5a   :  { %v1422_v4 = vld [vmem:[%s1948_s3 + $0x1a0] ss:$28 sps:$4 sm:$0xff]   ;;  %v1428_v7 = vld [vmem:[%s1948_s3 + $0x20c] ss:$28 sps:$4 sm:$0xff]   ;;  %v1437_v13 = vld [vmem:[%s1948_s3 + $0x2b4] ss:$28 sps:$4 sm:$0xff]  }
  0x5b   :  { %989 = vmatpush1.bf16.msra.mxu0 %v1373_v12  ;;  %v1431_v9 = vld [vmem:[%s1948_s3 + $0x244] ss:$28 sps:$4 sm:$0xff]   ;;  %v1434_v11 = vld [vmem:[%s1948_s3 + $0x27c] ss:$28 sps:$4 sm:$0xff]   ;;  %v1435_v14 = vld [vmem:[%s1948_s3 + $0x2b0] ss:$28 sps:$4 sm:$0xff]  }
  0x5c   :  { %990 = vmatprep.subr.bf16.mxu0 %v1381_v15  ;;  %v1429_v10 = vld [vmem:[%s1948_s3 + $0x240] ss:$28 sps:$4 sm:$0xff]   ;;  %v1432_v12 = vld [vmem:[%s1948_s3 + $0x278] ss:$28 sps:$4 sm:$0xff]   ;;  %v1440_v15 = vld [vmem:[%s1948_s3 + $0x2ec] ss:$28 sps:$4 sm:$0xff]  }
  0x5d   :  { %v1443_v17 = vld [vmem:[%s1948_s3 + $0x324] ss:$28 sps:$4 sm:$0xff]   ;;  %v1444_v20 = vld [vmem:[%s1948_s3 + $0x358] ss:$28 sps:$4 sm:$0xff]   ;;  %v318_v23 = vsub.s32 2, %v1766_v21 }
  0x5e   :  { %v1441_v18 = vld [vmem:[%s1948_s3 + $0x320] ss:$28 sps:$4 sm:$0xff]  }
  0x5f   :  { %991 = vmatpush1.bf16.msra.mxu0 %v1379_v16  ;;  %v1438_v16 = vld [vmem:[%s1948_s3 + $0x2e8] ss:$28 sps:$4 sm:$0xff]  }
  0x60   :  { %1239 = vmatprep.subr.bf16.mxu0 %v1386_v19  ;;  %v1446_v19 = vld [vmem:[%s1948_s3 + $0x35c] ss:$28 sps:$4 sm:$0xff]   ;;  %s1486_s3 = smov [#allocation2]  }
  0xf5   :  { %v165_v27 = vpop.f32.mrb[0].mxu0 }
  0xf6   :  { %v166_v28 = vadd.f32 %v165_v27, %v44_v25  ;;  %v167_v29 = vpop.f32.mrb[1].mxu0  ;;  %v306_v25 = vld [vmem:[%s1949_s4] sm:$0x7f]  ;;  %s1103_s4 = sshll.u32 %s1486_s3, 4  ;;  %s1104_s4 = int_to_ptr.vmem [resolvable:$true] %s1103_s4 }
  0xf7   :  { %v168_v30 = vadd.f32 %v167_v29, %v48_v26  ;;  %v169_v31 = vpop.f32.mrb[2].mxu0  ;;  %v322_v26 = vsub.s32 3, %v1766_v21  ;;  %v311_v27 = vrot.slane %v306_v25, %v43_v22  ;;  %v315_v29 = vrot.slane %v306_v25, %v47_v24  ;;  %s1461_s10 = scalar_lea.vmem %s1104_s4, 896  ;;  %p1466_p1 = scmp.lt.s32.totalorder %s1104_s4, %s1104_s4 }
  0xf8   :  { %v172_v32 = vmul.f32 0.01, %v166_v28  ;;  %v170_v33 = vpop.f32.mrb[3].mxu0  ;;  %p1462_p0 = scmp.ne.s32.totalorder %s1104_s4, %s1461_s10  ;;  %p1467_p2 = scmp.lt.s32.totalorder %s1461_s10, %s1461_s10 }
  0xf9   :  { %v173_v34 = vmul.f32 0.01, %v168_v30 }
  0xfa   :  { %v174_v35 = vmax.f32 %v166_v28, %v172_v32  ;;  %v319_v28 = vrot.slane %v306_v25, %v318_v23  ;;  %p1468_p3 = por %p1467_p2, %p1466_p1 }
  0xfb   :  { %v175_v36 = vmax.f32 %v168_v30, %v173_v34  ;;  %v323_v30 = vrot.slane %v306_v25, %v322_v26 }
  0xfc   :  { %v1783_v40 = vpack.c.bf16 %v174_v35, %v174_v35  ;;  %p1469_p4 = pnand %p1468_p3, %p1462_p0 }
  0xfd   :  { %v177_v37 = vpack.c.bf16 %v175_v36, %v175_v36 }
  0xff   :  { %951 = vmatprep.mubr.bf16.mxu1 %v177_v37  ;;  %992 = vmatprep.mubr.bf16.mxu0 %v177_v37 }
 0x100   :  { %952 = vmatmul.mubr.bf16.vlgmr.msra.gmra.mrb[0].mxu1 %v1783_v40  ;;  %993 = vmatmul.mubr.bf16.vlgmr.msra.gmra.mrb[4].mxu0 %v1783_v40 }
 0x101   :  { %1002 = vmatpush1.bf16.msra.mxu1 %v1383_v38  ;;  %1240 = vmatpush3.bf16.msra.mxu0 %v1387_v39 }
 0x102   :  { %1033 = vmatprep.mubr.bf16.mxu1 %v177_v37  ;;  %1074 = vmatprep.mubr.bf16.mxu0 %v177_v37 }
 0x103   :  { %1003 = vmatprep.subr.bf16.mxu1 %v1390_v41  ;;  %1241 = vmatprep.subr.bf16.mxu0 %v1391_v42 }
 0x105   :  { %1004 = vmatpush1.bf16.msra.mxu1 %v1388_v43  ;;  %1242 = vmatpush3.bf16.msra.mxu0 %v1392_v44 }
 0x106   :  { %1005 = vmatprep.subr.bf16.mxu1 %v1395_v45  ;;  %1243 = vmatprep.subr.bf16.mxu0 %v1396_v46  ;;  %v334_v45 = vsub.s32 6, %v1766_v21 }
 0x109   :  { %1006 = vmatpush1.bf16.msra.mxu1 %v1393_v47  ;;  %1244 = vmatpush3.bf16.msra.mxu0 %v1397_v48  ;;  %v335_v47 = vrot.slane %v306_v25, %v334_v45 }
 0x10a   :  { %1007 = vmatprep.subr.bf16.mxu1 %v1400_v49  ;;  %1245 = vmatprep.subr.bf16.mxu0 %v1401_v50 }
 0x10d   :  { %1008 = vmatpush1.bf16.msra.mxu1 %v1398_v51  ;;  %1246 = vmatpush3.bf16.msra.mxu0 %v1402_v52 }
 0x10e   :  { %1009 = vmatprep.subr.bf16.mxu1 %v1405_v53  ;;  %1247 = vmatprep.subr.bf16.mxu0 %v1406_v54  ;;  %v326_v54 = vsub.s32 4, %v1766_v21 }
 0x111   :  { %1010 = vmatpush1.bf16.msra.mxu1 %v1403_v55  ;;  %1248 = vmatpush3.bf16.msra.mxu0 %v1407_v56  ;;  %v330_v55 = vsub.s32 5, %v1766_v21  ;;  %v327_v56 = vrot.slane %v306_v25, %v326_v54 }
 0x112   :  { %1011 = vmatprep.subr.bf16.mxu1 %v1410_v57  ;;  %1249 = vmatprep.subr.bf16.mxu0 %v1411_v58 }
 0x113   :  { %v331_v57 = vrot.slane %v306_v25, %v330_v55 }
 0x115   :  { %1012 = vmatpush1.bf16.msra.mxu1 %v1408_v59  ;;  %1250 = vmatpush3.bf16.msra.mxu0 %v1412_v60 }
 0x116   :  { %1013 = vmatprep.subr.bf16.mxu1 %v1415_v61  ;;  %1251 = vmatprep.subr.bf16.mxu0 %v1416_v62 }
 0x119   :  { %1014 = vmatpush1.bf16.msra.mxu1 %v1413_v63  ;;  %1252 = vmatpush3.bf16.msra.mxu0 %v1417_v0 }
 0x11a   :  { %1015 = vmatprep.subr.bf16.mxu1 %v1420_v1  ;;  %1253 = vmatprep.subr.bf16.mxu0 %v1421_v2 }
 0x11d   :  { %1016 = vmatpush1.bf16.msra.mxu1 %v1418_v3  ;;  %1254 = vmatpush3.bf16.msra.mxu0 %v1422_v4 }
 0x11e   :  { %1017 = vmatprep.subr.bf16.mxu1 %v1425_v5 }
 0x120   :  { %1075 = vmatmul.mubr.bf16.vlgmr.msra.gmra.mrb[8].mxu0 %v1783_v40 }
 0x121   :  { %1018 = vmatpush1.bf16.msra.mxu1 %v1423_v6 }
 0x122   :  { %1019 = vmatprep.subr.bf16.mxu1 %v1428_v7 }
 0x125   :  { %1020 = vmatpush1.bf16.msra.mxu1 %v1426_v8 }
 0x126   :  { %1021 = vmatprep.subr.bf16.mxu1 %v1431_v9 }
 0x129   :  { %1022 = vmatpush1.bf16.msra.mxu1 %v1429_v10 }
 0x12a   :  { %1023 = vmatprep.subr.bf16.mxu1 %v1434_v11 }
 0x12d   :  { %1024 = vmatpush1.bf16.msra.mxu1 %v1432_v12 }
 0x12e   :  { %1025 = vmatprep.subr.bf16.mxu1 %v1437_v13 }
 0x131   :  { %1026 = vmatpush1.bf16.msra.mxu1 %v1435_v14 }
 0x132   :  { %1027 = vmatprep.subr.bf16.mxu1 %v1440_v15 }
 0x135   :  { %1028 = vmatpush1.bf16.msra.mxu1 %v1438_v16 }
 0x136   :  { %1029 = vmatprep.subr.bf16.mxu1 %v1443_v17 }
 0x139   :  { %1030 = vmatpush1.bf16.msra.mxu1 %v1441_v18 }
 0x13a   :  { %1031 = vmatprep.subr.bf16.mxu1 %v1446_v19 }
 0x13d   :  { %1032 = vmatpush1.bf16.msra.mxu1 %v1444_v20 }
 0x140   :  { %1034 = vmatmul.mubr.bf16.vlgmr.msra.gmra.mrb[4].mxu1 %v1783_v40 }
 0x1d3   :  { %v953_v31 = vpop.f32.mrb[0].mxu1  ;;  %v994_v32 = vpop.f32.mrb[4].mxu0 }
 0x1d4   :  { %v954_v33 = vadd.f32 %v953_v31, %v311_v27  ;;  %v995_v34 = vadd.f32 %v994_v32, %v319_v28  ;;  %v955_v35 = vpop.f32.mrb[1].mxu1  ;;  %v996_v36 = vpop.f32.mrb[5].mxu0 }
 0x1d5   :  { %v956_v37 = vadd.f32 %v955_v35, %v315_v29  ;;  %v997_v38 = vadd.f32 %v996_v36, %v323_v30  ;;  %v957_v39 = vpop.f32.mrb[2].mxu1  ;;  %v998_v40 = vpop.f32.mrb[6].mxu0 }
 0x1d6   :  { %1447 = vtanh.f32 %v954_v33  ;;  %v958_v41 = vpop.f32.mrb[3].mxu1  ;;  %v999_v42 = vpop.f32.mrb[7].mxu0 }
 0x1d7   :  { %1449 = vtanh.f32 %v995_v34 }
 0x1d8   :  { %1451 = vtanh.f32 %v956_v37 }
 0x1d9   :  { %1453 = vtanh.f32 %v997_v38 }
 0x1e0   :  { %v1448_v22 = vpop.eup %1447 }
 0x1e1   :  { %v1450_v43 = vpop.eup %1449  ;;  %1089 = vst [vmem:[#allocation2] sm:$0xff] %v1448_v22 }
 0x1e2   :  { %v1452_v24 = vpop.eup %1451  ;;  %1091 = vst [vmem:[#allocation2 + $0x10] sm:$0xff] %v1450_v43 }
 0x1e3   :  { %v1454_v44 = vpop.eup %1453  ;;  %1090 = vst [vmem:[#allocation2 + $0x8] sm:$0xff] %v1452_v24 }
 0x1e4   :  { %1092 = vst [vmem:[#allocation2 + $0x18] sm:$0xff] %v1454_v44 }
 0x1f3   :  { %v1255_v46 = vpop.f32.mrb[8].mxu0 }
 0x1f4   :  { %v1256_v48 = vpop.f32.mrb[9].mxu0 }
 0x1f5   :  { %v1257_v49 = vadd.f32 %v1256_v48, %v1255_v46  ;;  %v1258_v50 = vpop.f32.mrb[10].mxu0 }
 0x1f6   :  { %v1259_v51 = vpop.f32.mrb[11].mxu0 }
 0x1f7   :  { %v1077_v52 = vadd.f32 %v1257_v49, %v335_v47 }
 0x1f9   :  { %1455 = vtanh.f32 %v1077_v52 }
 0x203   :  { %v1456_v53 = vpop.eup %1455 }
 0x204   :  { %1096 = vst.msk [vmem:[#allocation2 + $0x30] sm:$0xff] %vm1095_vm0, %v1456_v53 }
 0x213   :  { %v1035_v58 = vpop.f32.mrb[4].mxu1 }
 0x214   :  { %v1036_v59 = vadd.f32 %v1035_v58, %v327_v56  ;;  %v1037_v60 = vpop.f32.mrb[5].mxu1 }
 0x215   :  { %v1038_v61 = vadd.f32 %v1037_v60, %v331_v57  ;;  %v1039_v62 = vpop.f32.mrb[6].mxu1 }
 0x216   :  { %1457 = vtanh.f32 %v1036_v59  ;;  %v1040_v63 = vpop.f32.mrb[7].mxu1 }
 0x217   :  { %1459 = vtanh.f32 %v1038_v61 }
 0x220   :  { %v1458_v0 = vpop.eup %1457 }
 0x221   :  { %v1460_v1 = vpop.eup %1459  ;;  %1093 = vst [vmem:[#allocation2 + $0x20] sm:$0xff] %v1458_v0 }
 0x222   :  { %1094 = vst [vmem:[#allocation2 + $0x28] sm:$0xff] %v1460_v1 }
 0x223   :  { %1472 = shalt.err (!%p1469_p4)
}
 0x224   :  { %s1473_s13 = scalar_lea.hbm %s1950_s5, 896 }
 0x225   :  { %p1474_p5 = scmp.ne.s32.totalorder %s1950_s5, %s1473_s13  ;;  %p1477_p6 = scmp.lt.u32.totalorder %s1473_s13, %s1950_s5 }
 0x227   :  { %p1479_p7 = pnand %p1477_p6, %p1474_p5 }
 0x229   :  { %1482 = shalt.err (!%p1479_p7)
}
 0x22a   :  { %1106 = dma.vmem_to_hbm [thread:$0]  %s1104_s4, 896, %s1950_s5, [#allocation3]  }
 0x22b   :  { %1483 = dma.done.wait [#allocation3], 896  }
 0x22c   :  { %1484 = vsyncadd [#allocation3], 4294966400 }
 0x22d   :  { %1110 = vsyncpa [#allocation3], 1 }

</bundles_post_ra>
